<compile_context>
chip_gen: v7x
topology: tpu7x:2x2x1
jax: 0.10.0
libtpu: 0.0.40
codegen_flags: <defaults>
</compile_context>

<pallas_src>
import jax
import jax.numpy as jnp
from jax.experimental import pallas as pl
from jax.experimental.pallas import tpu as pltpu


def _se_kernel(x_ref, w1t_ref, w2t_ref, o_ref):
    # x_ref: (Bt, C, HW)   w1t_ref: (C, Cr)   w2t_ref: (Cr, C)   o_ref: (Bt, C, HW)
    x = x_ref[...].astype(jnp.float32)                       # (Bt, C, HW)

    # Squeeze: per-(batch, channel) global average over the spatial (lane) axis.
    y = jnp.mean(x, axis=-1)                                  # (Bt, C)

    # Excite: one batched fc1 -> ReLU -> fc2 -> sigmoid per block.
    h = jnp.dot(y, w1t_ref[...], preferred_element_type=jnp.float32)   # (Bt, Cr)
    h = jnp.maximum(h, 0.0)
    s = jnp.dot(h, w2t_ref[...], preferred_element_type=jnp.float32)   # (Bt, C)
    s = jax.nn.sigmoid(s)

    # Scale: broadcast the per-(batch, channel) gate over the spatial lanes.
    o_ref[...] = (x * s[:, :, None]).astype(o_ref.dtype)


def _pick_batch_tile(batch, bytes_per_batch_elem, target_block_bytes):
    """Largest divisor of `batch` whose block stays within the VMEM budget and
    (when possible) leaves >=2 grid steps for dual-TensorCore chips."""
    cap = max(1, target_block_bytes // max(1, bytes_per_batch_elem))
    cap = min(batch, cap)
    if batch >= 2:
        cap = min(cap, max(1, batch // 2))     # >=2 "parallel" steps for v7x
    for bt in range(cap, 0, -1):
        if batch % bt == 0:
            return bt
    return 1


def se_layer(x, w1, w2, *, target_block_bytes=4 << 20, donate_input=False):
    """x: (B, C, H, W); w1: (C//r, C); w2: (C, C//r)  (PyTorch Linear layout)."""
    B, C, H, W = x.shape
    HW = H * W
    Cr = w1.shape[0]
    assert w1.shape == (Cr, C) and w2.shape == (C, Cr)

    x_flat = x.reshape(B, C, HW)               # free reshape (NCHW contiguous)
    # Transpose tiny weights once in the wrapper so the kernel does plain
    # NN-contraction matmuls (no in-kernel transposes).
    w1_t = jnp.transpose(w1)                   # (C, Cr)
    w2_t = jnp.transpose(w2)                   # (Cr, C)

    itemsize = jnp.dtype(x.dtype).itemsize
    bt = _pick_batch_tile(B, C * HW * itemsize, target_block_bytes)
    grid = (B // bt,)

    # Explicit scoped-VMEM budget: double-buffered input + output blocks plus
    # the (tiny) weights, with headroom.  Kept well under v5e's 16 MiB default
    # and v7x's 64 MiB physical VMEM for the default target block size.
    block_bytes = bt * C * HW * itemsize
    w_bytes = (w1.size + w2.size) * jnp.dtype(w1.dtype).itemsize
    vmem_limit = int(min(64 << 20,
                         max(16 << 20, 4 * block_bytes + 2 * w_bytes + (2 << 20))))

    extra = {}
    if donate_input:
        # In-place update of x (saves one HBM allocation) when the caller no
        # longer needs the input activations.
        extra["input_output_aliases"] = {0: 0}

    out_flat = pl.pallas_call(
        _se_kernel,
        out_shape=jax.ShapeDtypeStruct((B, C, HW), x.dtype),
        grid_spec=pltpu.PrefetchScalarGridSpec(
            num_scalar_prefetch=0,
            grid=grid,
            in_specs=[
                pl.BlockSpec((bt, C, HW), lambda b: (b, 0, 0)),
                pl.BlockSpec((C, Cr), lambda b: (0, 0)),
                pl.BlockSpec((Cr, C), lambda b: (0, 0)),
            ],
            out_specs=pl.BlockSpec((bt, C, HW), lambda b: (b, 0, 0)),
        ),
        compiler_params=pltpu.CompilerParams(
            dimension_semantics=("parallel",),
            vmem_limit_bytes=vmem_limit,
        ),
        **extra,
    )(x_flat, w1_t, w2_t)

    return out_flat.reshape(B, C, H, W)


def se_layer_reference(x, w1, w2):
    """Pure-JAX reference mirroring the PyTorch module."""
    y = jnp.mean(x, axis=(2, 3))                       # (B, C)
    h = jnp.maximum(y @ w1.T, 0.0)                     # (B, C//r)
    s = jax.nn.sigmoid(h @ w2.T)                       # (B, C)
    return x * s[:, :, None, None]


if __name__ == "__main__":
    # Small shapes consistent with SELayer(channel=32, reduction=16).
    B, C, H, W = 2, 32, 8, 8
    reduction = 16
    Cr = C // reduction

    key = jax.random.PRNGKey(0)
    kx, k1, k2 = jax.random.split(key, 3)
    x = jax.random.normal(kx, (B, C, H, W), dtype=jnp.float32)
    # Deterministic synthetic weights in PyTorch Linear layout (out, in).
    w1 = jax.random.normal(k1, (Cr, C), dtype=jnp.float32) * (1.0 / C) ** 0.5
    w2 = jax.random.normal(k2, (C, Cr), dtype=jnp.float32) * (1.0 / Cr) ** 0.5

    out = jax.block_until_ready(se_layer(x, w1, w2))

    ref = se_layer_reference(x, w1, w2)
    if not jnp.allclose(out, ref, atol=1e-5, rtol=1e-5):
        raise AssertionError("Pallas SELayer output does not match reference")

    print("KERNEL_OK")
</pallas_src>

<mosaic_0001>
module attributes {stable_mosaic.version = 11 : i64} {
  func.func @_se_kernel(%arg0: i32, %arg1: memref<1x32x64xf32, #tpu.memory_space<vmem>>, %arg2: memref<32x2xf32, #tpu.memory_space<vmem>>, %arg3: memref<2x32xf32, #tpu.memory_space<vmem>>, %arg4: memref<1x32x64xf32, #tpu.memory_space<vmem>>) attributes {dimension_semantics = [#tpu.dimension_semantics<parallel>], iteration_bounds = array<i64: 2>, scalar_prefetch = 0 : i64, scratch_operands = 0 : i64, tpu.core_type = #tpu.core_type<tc>, window_params = [{transform_indices = @transform_0, window_bounds = array<i64: 1, 32, 64>}, {pipeline_mode = #tpu.pipeline_mode<synchronous>, transform_indices = @transform_1, window_bounds = array<i64: 32, 2>}, {pipeline_mode = #tpu.pipeline_mode<synchronous>, transform_indices = @transform_2, window_bounds = array<i64: 2, 32>}, {transform_indices = @transform_3, window_bounds = array<i64: 1, 32, 64>}]} {
    %c0 = arith.constant 0 : index
    %c0_0 = arith.constant 0 : index
    %c0_1 = arith.constant 0 : index
    %0 = vector.load %arg1[%c0, %c0_0, %c0_1] : memref<1x32x64xf32, #tpu.memory_space<vmem>>, vector<1x32x64xf32>
    %cst = arith.constant dense<0.000000e+00> : vector<1x32xf32>
    %1 = vector.multi_reduction <add>, %0, %cst [2] : vector<1x32x64xf32> to vector<1x32xf32>
    %cst_2 = arith.constant 6.400000e+01 : f32
    %2 = vector.broadcast %cst_2 : f32 to vector<1x32xf32>
    %3 = arith.divf %1, %2 : vector<1x32xf32>
    %c0_3 = arith.constant 0 : index
    %c0_4 = arith.constant 0 : index
    %4 = vector.load %arg2[%c0_3, %c0_4] : memref<32x2xf32, #tpu.memory_space<vmem>>, vector<32x2xf32>
    %cst_5 = arith.constant dense<0.000000e+00> : vector<1x2xf32>
    %5 = tpu.matmul %3, %4, %cst_5 {dimension_numbers = #tpu.dot_dimension_numbers<[1], [0], [0], [1], [0, 0, 1, 1], [], []>} : vector<1x32xf32>, vector<32x2xf32>, vector<1x2xf32> -> vector<1x2xf32>
    %cst_6 = arith.constant 0.000000e+00 : f32
    %6 = vector.broadcast %cst_6 : f32 to vector<1x2xf32>
    %7 = arith.maximumf %5, %6 : vector<1x2xf32>
    %c0_7 = arith.constant 0 : index
    %c0_8 = arith.constant 0 : index
    %8 = vector.load %arg3[%c0_7, %c0_8] : memref<2x32xf32, #tpu.memory_space<vmem>>, vector<2x32xf32>
    %cst_9 = arith.constant dense<0.000000e+00> : vector<1x32xf32>
    %9 = tpu.matmul %7, %8, %cst_9 {dimension_numbers = #tpu.dot_dimension_numbers<[1], [0], [0], [1], [0, 0, 1, 1], [], []>} : vector<1x2xf32>, vector<2x32xf32>, vector<1x32xf32> -> vector<1x32xf32>
    %10 = arith.negf %9 : vector<1x32xf32>
    %11 = math.exp %10 : vector<1x32xf32>
    %cst_10 = arith.constant 1.000000e+00 : f32
    %12 = vector.broadcast %cst_10 : f32 to vector<1x32xf32>
    %13 = arith.addf %12, %11 : vector<1x32xf32>
    %14 = arith.divf %12, %13 : vector<1x32xf32>
    %15 = vector.shape_cast %14 : vector<1x32xf32> to vector<1x32x1xf32>
    %16 = vector.broadcast %15 : vector<1x32x1xf32> to vector<1x32x64xf32>
    %17 = arith.mulf %0, %16 : vector<1x32x64xf32>
    %c0_11 = arith.constant 0 : index
    %c0_12 = arith.constant 0 : index
    %c0_13 = arith.constant 0 : index
    %18 = vector.load %arg4[%c0_11, %c0_12, %c0_13] : memref<1x32x64xf32, #tpu.memory_space<vmem>>, vector<1x32x64xf32>
    tpu.vector_store %arg4[%c0_11, %c0_12, %c0_13], %17 {strides = array<i32>} : memref<1x32x64xf32, #tpu.memory_space<vmem>>, vector<1x32x64xf32>,
    return
  }
  func.func @transform_0(%arg0: i32) -> (i32, i32, i32) {
    %c0_i32 = arith.constant 0 : i32
    %c0_i32_0 = arith.constant 0 : i32
    %c0_i32_1 = arith.constant 0 : i32
    return %arg0, %c0_i32, %c0_i32_0 : i32, i32, i32
  }
  func.func @transform_1(%arg0: i32) -> (i32, i32) {
    %c0_i32 = arith.constant 0 : i32
    %c0_i32_0 = arith.constant 0 : i32
    %c0_i32_1 = arith.constant 0 : i32
    return %c0_i32, %c0_i32_0 : i32, i32
  }
  func.func @transform_2(%arg0: i32) -> (i32, i32) {
    %c0_i32 = arith.constant 0 : i32
    %c0_i32_0 = arith.constant 0 : i32
    %c0_i32_1 = arith.constant 0 : i32
    return %c0_i32, %c0_i32_0 : i32, i32
  }
  func.func @transform_3(%arg0: i32) -> (i32, i32, i32) {
    %c0_i32 = arith.constant 0 : i32
    %c0_i32_0 = arith.constant 0 : i32
    %c0_i32_1 = arith.constant 0 : i32
    return %arg0, %c0_i32, %c0_i32_0 : i32, i32, i32
  }
}

</mosaic_0001>

<bundles_post_ra>
// kernel: tpu_custom_call.1
= control target key start
LH: loop header
LB: loop body
LE: loop exit
PB: predicated region body
PF: predicated region fallthrough
CT: control target
= control target key end

     0   :  { %8 = vsyncpa [#allocation3], 0  ;;  %s957_s0 = inlined_call_operand.hbm [shape: f32[2,32,64], index: 0, kind: input, shape index: {}]   ;;  %s958_s1 = inlined_call_operand.vmem [shape: f32[32,2], index: 1, kind: input, shape index: {}]   ;;  %s959_s2 = inlined_call_operand.vmem [shape: f32[2,32], index: 2, kind: input, shape index: {}]   ;;  %s960_s3 = inlined_call_operand.hbm [shape: f32[2,32,64], index: 3, kind: output, shape index: {}]  }
   0x1   :  { %10 = vsyncpa [#allocation3 + $0x1], 0 }
   0x2   :  { %11 = vsyncpa [#allocation4], 0 }
   0x3   :  { %13 = vsyncpa [#allocation4 + $0x1], 0  ;;  %s752_s12 = smov 0   ;;  %s754_s13 = smov 0  }
   0x4   :  { %s756_s14 = smov 0   ;;  %s758_s15 = smov 0  }
   0x5 LB: > { %s773_s16 = sadd.s32 4294967295, %s721_s15   ;;  %s519_s17 = sadd.s32 4294967294, %s721_s15   ;;  %s721_s15 = sphi %s758_s15, %s973_s15   ;;  %s717_s14 = sphi %s756_s14, %s972_s14   ;;  %s713_s13 = sphi %s754_s13, %s971_s13   ;;  %s709_s12 = sphi %s752_s12, %s970_s12  }
   0x6   : > { %s777_s18 = sadd.s32 1, %s721_s15   ;;  %s26_s19 = sadd.s32 1, %s717_s14 }
   0x7   : > { %s23_s20 = ssub.s32 %s721_s15, %s777_s18  ;;  %p33_p0 = scmp.ne.s32.totalorder %s717_s14, %s713_s13 }
   0x8   : > { %p24_p1 = scmp.eq.s32.totalorder %s23_s20, 0  ;;  %p34_p2 = scmp.eq.s32.totalorder %s721_s15, 0 }
   0x9   : > { %p39_p3 = scmp.ne.s32.totalorder %s713_s13, %s709_s12  ;;  %p40_p4 = scmp.eq.s32.totalorder %s773_s16, 0 }
   0xa   : > { %s789_s21 = scalar_select %p24_p1, %s717_s14, %s26_s19  }
   0xb   : > { %p791_p5 = por %p34_p2, %p33_p0  ;;  %p795_p6 = por %p40_p4, %p39_p3 }
   0xc   : > { %p105_p7 = scmp.eq.s32.totalorder %s773_s16, 1  ;;  %p111_p8 = scmp.eq.s32.totalorder %s519_s17, 1 }
   0xd   : > { %p580_p10 = scmp.lt.s32.totalorder %s721_s15, 2  ;;  %s137_s26 = sand.u32 1, %s717_s14  }
   0xe   : > { %p802_p11 = por %p105_p7, %p33_p0  ;;  %p806_p12 = por %p111_p8, %p39_p3 }
   0xf   : > { %s537_s27 = sshll.u32 %s721_s15, 9  ;;  %s522_s28 = sshll.u32 %s137_s26, 5 }
  0x10   : > { %s964_s24 = scalar_select %p802_p11, 1, 0 }
  0x11   : > { %s965_s25 = scalar_select %p806_p12, 1, 0 }
  0x12   : > { %s815_s4 = scalar_lea.hbm %s957_s0, %s537_s27  ;;  %s141_s5 = scalar_lea.vmem [#allocation2], %s522_s28 }
  0x13   : > { %s148_s6 = sshll.u32 %s141_s5, 4  ;;  %p819_p13 = pnand %p580_p10, %p791_p5  ;;  %s823_s6 = int_to_ptr.vmem [resolvable:$true] %s148_s6 }
  0x14   : > { %s825_s8 = scalar_lea.sflag [#allocation3], %s137_s26  ;;  %s625_s9 = scalar_lea.hbm %s815_s4, 512 }
  0x15   : > { %p626_p0 = scmp.ne.s32.totalorder %s815_s4, %s625_s9  ;;  %p627_p1 = pneg %p819_p13 }
  0x16   : > { %s630_s17 = scalar_lea.hbm %s957_s0, 1024  ;;  %p631_p4 = scmp.lt.u32.totalorder %s815_s4, %s957_s0 }
  0x17   : > { %p628_p2 = pnand %p627_p1, %p626_p0  ;;  %p632_p5 = scmp.lt.u32.totalorder %s630_s17, %s625_s9 }
  0x18   : > { %p634_p8 = scmp.lt.u32.totalorder %s625_s9, %s815_s4 }
  0x19   : > { %p629_p3 = pneg %p628_p2  ;;  %p633_p7 = por %p632_p5, %p631_p4 }
  0x1b   : > { %p635_p10 = por %p634_p8, %p633_p7 }
  0x1d   : > { %p636_p9 = pnand %p635_p10, %p629_p3 }
  0x1f   : > { %639 = shalt.err (!%p636_p9)
}
  0x20   : > { %s640_s22 = scalar_lea.vmem %s823_s6, 512  ;;  %s723_s26 = smov [#allocation2]  }
  0x21   : > { %p641_p0 = scmp.ne.s32.totalorder %s823_s6, %s640_s22  ;;  %s645_s27 = sshll.u32 %s723_s26, 4  ;;  %s646_s27 = int_to_ptr.vmem [resolvable:$false] %s645_s27 }
  0x22   : > { %s647_s28 = scalar_lea.vmem %s646_s27, 1024  ;;  %p648_p11 = scmp.lt.s32.totalorder %s823_s6, %s646_s27 }
  0x23   : > { %p643_p2 = pnand %p641_p0, %p627_p1  ;;  %p649_p4 = scmp.lt.s32.totalorder %s647_s28, %s640_s22 }
  0x25   : > { %p644_p12 = pneg %p643_p2  ;;  %p650_p5 = por %p649_p4, %p648_p11 }
  0x27   : > { %p651_p7 = pnand %p650_p5, %p644_p12 }
  0x29   : > { %654 = shalt.err (!%p651_p7)
}
  0x2a   : > { %s724_s29 = smov 128   ;;  %s725_s30 = smov 8  }
  0x2b   : > { %575 = dma.hbm_to_vmem [thread:$0]  (!%p819_p13), %s815_s4, 512, %s823_s6, %s825_s8, %s724_s29, %s724_s29, %s725_s30  }
  0x2c   : > { %p525_p9 = scmp.ge.s32.totalorder %s721_s15, 1  ;;  %p156_p1 = scmp.lt.s32.totalorder %s721_s15, 3 }
  0x2e   : > { %p157_p3 = pnand %p525_p9, %p156_p1 }
  0x2f   : > { %s856_s5 = sand.u32 (!%p157_p3), 1, %s713_s13  }
  0x30   : > { %160 = sbr.rel (%p157_p3) target bundleno = 805 (0x325), region = 32  ;;  %s526_s9 = sshll.u32 (!%p157_p3), %s856_s5, 5 }
  0x31   : > { %s163_s10 = scalar_lea.sflag (!%p157_p3), [#allocation3], %s856_s5  ;;  %s166_s11 = scalar_lea.vmem (!%p157_p3), [#allocation2], %s526_s9 }
  0x37   : > { %700 = dma.done.wait (%p795_p6), %s163_s10, 512  }
  0x38   : > { %702 = vsyncadd (%p795_p6), %s163_s10, 4294966784  ;;  %vm193_vm0 = vcmask 523264   ;;  %v866_v0 = vld [vmem:[%s166_s11] sm:$0xff]  ;;  %v868_v1 = vld [vmem:[%s166_s11 + $0x10] sm:$0xff]  ;;  %v726_v10 = vmov 0.0|0.0   ;;  %vm727_vm1 = vmmov 0   ;;  %v219_v16 = vlaneseq }
  0x39   : > { %v870_v2 = vld [vmem:[%s166_s11 + $0x8] sm:$0xff]  ;;  %v194_v3 = vsel %vm193_vm0, %v866_v0, 0.0  ;;  %v200_v4 = vsel %vm193_vm0, %v868_v1, 0.0  ;;  %v876_v5 = vld [vmem:[%s166_s11 + $0x18] sm:$0xff]  ;;  %v211_v8 = vld [vmem:[%s958_s1] sm:$0xff]  ;;  %562 = vmatprep.subr.bf16.mxu0 %v726_v10  ;;  %v728_v15 = vmov 0.0  }
  0x3a   : > { %195 = vadd.xlane.f32.xlu0 %v194_v3  ;;  %201 = vadd.xlane.f32.xlu1 %v200_v4  ;;  %v197_v6 = vsel %vm193_vm0, %v870_v2, 0.0  ;;  %v203_v7 = vsel %vm193_vm0, %v876_v5, 0.0  ;;  %v212_v9 = vld [vmem:[%s958_s1 + $0x8] sm:$0xff]  ;;  %v213_v12 = vld [vmem:[%s958_s1 + $0x10] sm:$0xff]  ;;  %v214_v13 = vld [vmem:[%s958_s1 + $0x18] sm:$0xff]  ;;  %v220_v17 = vand.u32 127, %v219_v16 }
  0x3b   : > { %v563_v11 = vpack.c.bf16 %v212_v9, %v211_v8  ;;  %v566_v14 = vpack.c.bf16 %v214_v13, %v213_v12  ;;  %554 = vmatprep.mubr.msk.f32.mxu0 %vm727_vm1, %v728_v15  ;;  %557 = vmatprep.subr.mxu1 %v728_v15  ;;  %v222_v18 = vshrl.u32 %v219_v16, 7  ;;  %vm230_vm2 = vcmask 130112   ;;  %v320_v41 = vld [vmem:[%s959_s2] sm:$0x3]  ;;  %s188_s27 = scalar_lea.vmem [#allocation5], %s526_s9  ;;  %s538_s29 = sshll.u32 %s773_s16, 9 }
  0x3c   : > { %559 = vmatprep.mubr.msk.f32.mxu1 %vm727_vm1, %v728_v15  ;;  %v225_v19 = vadd.s32 4294967288, %v220_v17  ;;  %v239_v20 = vadd.s32 4294967272, %v220_v17  ;;  %v232_v22 = vadd.s32 4294967280, %v220_v17  ;;  %vm237_vm3 = vcmask 195712   ;;  %s446_s28 = sshll.u32 %s188_s27, 4  ;;  %s911_s10 = scalar_lea.hbm %s960_s3, %s538_s29  ;;  %s905_s28 = int_to_ptr.vmem [resolvable:$true] %s446_s28 }
  0x3d   : > { %564 = vmatpush3.bf16.msra.mxu0 %v563_v11  ;;  %v223_v24 = vsub.s32 %v220_v17, %v222_v18  ;;  %vm244_vm4 = vcmask 261312   ;;  %vm246_vm5 = vcmask 261120   ;;  %vm325_vm6 = vcmask 1041408   ;;  %s433_s11 = scalar_lea.sflag [#allocation4], %s856_s5  ;;  %s655_s23 = scalar_lea.vmem %s905_s28, 512 }
  0x3e   : > { %198 = vadd.xlane.f32.xlu0 %v197_v6  ;;  %204 = vadd.xlane.f32.xlu1 %v203_v7  ;;  %v228_v26 = vsub.s32 %v225_v19, %v222_v18  ;;  %v242_v27 = vsub.s32 %v239_v20, %v222_v18  ;;  %v235_v28 = vsub.s32 %v232_v22, %v222_v18  ;;  %vm321_vm7 = vcmask 15360   ;;  %p656_p6 = scmp.ne.s32.totalorder %s905_s28, %s655_s23  ;;  %p967_p11 = scmp.ne.s32.totalorder %s964_s24, 0 }
  0x3f   : > { %565 = vmatprep.subr.bf16.mxu0 %v726_v10  ;;  %558 = vmatpush3.msk.msra.mxu1 %vm325_vm6, %v320_v41  ;;  %v407_v50 = vsub.s32 0, %v222_v18  ;;  %s729_s16 = smov [#allocation5]  }
  0x40   : > { %p657_p12 = pnand %p656_p6, %p967_p11  ;;  %s659_s4 = sshll.u32 %s729_s16, 4  ;;  %s660_s4 = int_to_ptr.vmem [resolvable:$false] %s659_s4 }
  0x41   : > { %567 = vmatpush3.bf16.msra.mxu0 %v566_v14  ;;  %s661_s6 = scalar_lea.vmem %s660_s4, 1024  ;;  %p662_p8 = scmp.lt.s32.totalorder %s905_s28, %s660_s4 }
  0x42   : > { %p658_p13 = pneg %p657_p12  ;;  %p663_p10 = scmp.lt.s32.totalorder %s661_s6, %s655_s23 }
  0x44   : > { %p664_p0 = por %p663_p10, %p662_p8 }
  0x46   : > { %p665_p2 = pnand %p664_p0, %p658_p13 }
  0xc7   : > { %v196_v21 = vpop.xlane.xlu0 %195  ;;  %v202_v23 = vpop.xlane.xlu1 %201 }
  0xc8   : > { %v207_v25 = vmul.f32 0.015625, %v196_v21  ;;  %v209_v29 = vmul.f32 0.015625, %v202_v23 }
  0xca   : > { %v224_v34 = vrot.slane %v207_v25, %v223_v24  ;;  %v236_v37 = vrot.slane %v209_v29, %v235_v28 }
  0xcb   : > { %v199_v30 = vpop.xlane.xlu0 %198  ;;  %v205_v31 = vpop.xlane.xlu1 %204 }
  0xcc   : > { %v208_v32 = vmul.f32 0.015625, %v199_v30  ;;  %v210_v33 = vmul.f32 0.015625, %v205_v31 }
  0xce   : > { %v229_v35 = vrot.slane %v208_v32, %v228_v26  ;;  %v243_v36 = vrot.slane %v210_v33, %v242_v27 }
  0xd0   : > { %v231_v38 = vsel %vm230_vm2, %v229_v35, %v224_v34 }
  0xd1   : > { %v238_v39 = vsel %vm237_vm3, %v236_v37, %v231_v38 }
  0xd2   : > { %v245_v40 = vsel %vm244_vm4, %v243_v36, %v238_v39 }
  0xd3   : > { %555 = vmatmul.mubr.msk.f32.vlgmr.msra.gmra.mrb[0].mxu0 %vm246_vm5, %v245_v40 }
 0x1a6   : > { %v315_v42 = vpop.f32.mrb[0].mxu0 }
 0x1a7   : > { %v319_v43 = vmax.f32 %v315_v42, 0.0  ;;  %v556_v44 = vpop.f32.mrb[1].mxu0 }
 0x1a9   : > { %560 = vmatmul.mubr.msk.f32.vlgmr.msra.gmra.mrb[0].mxu1 %vm321_vm7, %v319_v43 }
 0x27c   : > { %v395_v45 = vpop.f32.mrb[0].mxu1 }
 0x27d   : > { %v531_v46 = vmul.f32 -1.442695, %v395_v45  ;;  %v561_v47 = vpop.f32.mrb[1].mxu1 }
 0x27f   : > { %621 = vpow2.f32 %v531_v46 }
 0x289   : > { %v622_v48 = vpop.eup %621 }
 0x28a   : > { %v402_v49 = vadd.f32 1.0, %v622_v48 }
 0x28c   : > { %623 = vrcp.f32 %v402_v49 }
 0x296   : > { %v624_v51 = vpop.eup %623 }
 0x297   : > { %v408_v52 = vrot.slane %v624_v51, %v407_v50 }
 0x299   : > { %414 = vbcast.lane.b32.xlu1 %v408_v52, 264  ;;  %410 = vbcast.lane.b32.xlu0 %v408_v52, 256 }
 0x29d   : > { %418 = vbcast.lane.b32.xlu1 %v408_v52, 272 }
 0x2a1   : > { %422 = vbcast.lane.b32.xlu1 %v408_v52, 280 }
 0x30b   : > { %v415_v53 = vpop.permute.xlu1 %414  ;;  %v411_v54 = vpop.permute.xlu0 %410 }
 0x30c   : > { %v425_v55 = vmul.f32 %v415_v53, %v870_v2  ;;  %v424_v56 = vmul.f32 %v411_v54, %v866_v0 }
 0x30e   : > { %429 = vst.msk [vmem:[%s188_s27 + $0x8] sm:$0xff] %vm193_vm0, %v425_v55  ;;  %428 = vst.msk [vmem:[%s188_s27] sm:$0xff] %vm193_vm0, %v424_v56 }
 0x30f   : > { %v419_v57 = vpop.permute.xlu1 %418 }
 0x310   : > { %v426_v58 = vmul.f32 %v419_v57, %v868_v1 }
 0x312   : > { %430 = vst.msk [vmem:[%s188_s27 + $0x10] sm:$0xff] %vm193_vm0, %v426_v58 }
 0x313   : > { %v423_v59 = vpop.permute.xlu1 %422 }
 0x314   : > { %v427_v60 = vmul.f32 %v423_v59, %v876_v5 }
 0x316   : > { %431 = vst.msk [vmem:[%s188_s27 + $0x18] sm:$0xff] %vm193_vm0, %v427_v60 }
 0x317   : > { %668 = shalt.err (!%p665_p2)
}
 0x318   : > { %s669_s7 = scalar_lea.hbm %s911_s10, 512  ;;  %s673_s19 = scalar_lea.hbm %s960_s3, 1024 }
 0x319   : > { %p670_p4 = scmp.ne.s32.totalorder %s911_s10, %s669_s7  ;;  %p674_p9 = scmp.lt.u32.totalorder %s911_s10, %s960_s3 }
 0x31a   : > { %p675_p1 = scmp.lt.u32.totalorder %s673_s19, %s669_s7  ;;  %p677_p6 = scmp.lt.u32.totalorder %s669_s7, %s911_s10 }
 0x31b   : > { %p671_p5 = pnand %p670_p4, %p967_p11 }
 0x31c   : > { %p676_p3 = por %p675_p1, %p674_p9 }
 0x31d   : > { %p672_p7 = pneg %p671_p5 }
 0x31e   : > { %p678_p12 = por %p677_p6, %p676_p3 }
 0x320   : > { %p679_p13 = pnand %p678_p12, %p672_p7 }
 0x322   : > { %682 = shalt.err (!%p679_p13)
}
 0x323   : > { %s730_s26 = smov 128   ;;  %s731_s27 = smov 8  }
 0x324   : > { %570 = dma.vmem_to_hbm [thread:$0]  (%p967_p11), %s905_s28, 512, %s911_s10, %s433_s11, %s730_s26, %s730_s26, %s731_s27  }
 0x325 PF: > { %s461_s29 = sand.u32 1, %s709_s12   ;;  %p968_p8 = scmp.ne.s32.totalorder %s965_s25, 0 }
 0x326   : > { %p969_p10 = scmp.ge.s32.totalorder %s721_s15, 2  ;;  %s462_s30 = scalar_lea.sflag [#allocation4], %s461_s29 }
 0x328   : > { %p577_p0 = pnand %p969_p10, %p968_p8 }
 0x32a   : > { %704 = dma.done.wait (!%p577_p0), %s462_s30, 512  }
 0x32b   : > { %706 = vsyncadd (!%p577_p0), %s462_s30, 4294966784  ;;  %p16_p2 = scmp.ge.s32.totalorder %s777_s18, 4   ;;  %s970_s12 = smov %s713_s13 }
 0x32c   : > { %s971_s13 = smov %s717_s14  ;;  %s972_s14 = smov %s789_s21 }
 0x32d   : > { %s973_s15 = smov %s777_s18  ;;  %18 = sbr.rel (!%p16_p2) target bundleno = 5 (0x5), region = 77 }
 0x334   :  { %467 = vsyncpa [#allocation3], 1 }
 0x335   :  { %469 = vsyncpa [#allocation3 + $0x1], 1 }
 0x336   :  { %470 = vsyncpa [#allocation4], 1 }
 0x337   :  { %472 = vsyncpa [#allocation4 + $0x1], 1 }

</bundles_post_ra>
